<compile_context>
chip_gen: v7x
topology: tpu7x:2x2x1
jax: 0.10.0
libtpu: 0.0.40
codegen_flags: <defaults>
</compile_context>

<pallas_src>
import numpy as np
import jax
import jax.numpy as jnp
from jax.experimental import pallas as pl
from jax.experimental.pallas import tpu as pltpu

MAX_ATOMIC_NUM = 100          # standard value in CDVAE-style codebases
HIDDEN_FEATURES = 32          # args.hidden_features
DECODER_H_DIM = 512           # fc_atom input dim
COORD_DIM = 3
LANE = 128                    # TPU lane width
NEG_FILL = -1e9               # fill for padded logit columns


def _round_up(x, m):
    return ((x + m - 1) // m) * m


# ----------------------------------------------------------------------------
# Pallas kernels
# ----------------------------------------------------------------------------
def fc_coord_kernel(x_ref, w1_ref, b1_ref, w2_ref, b2_ref,
                    w3_ref, b3_ref, w4_ref, b4_ref, o_ref):
    """build_mlp(H, H, 3, 3): 3x (Linear+ReLU) then Linear(H, 3->128 lane-dense)."""
    h = x_ref[...]
    h = jnp.maximum(
        jnp.dot(h, w1_ref[...], preferred_element_type=jnp.float32) + b1_ref[...], 0.0)
    h = jnp.maximum(
        jnp.dot(h, w2_ref[...], preferred_element_type=jnp.float32) + b2_ref[...], 0.0)
    h = jnp.maximum(
        jnp.dot(h, w3_ref[...], preferred_element_type=jnp.float32) + b3_ref[...], 0.0)
    out = jnp.dot(h, w4_ref[...], preferred_element_type=jnp.float32) + b4_ref[...]
    o_ref[...] = out.astype(o_ref.dtype)


def fc_atom_kernel(h_ref, w_ref, b_ref, o_ref):
    """nn.Linear(512, 100 -> 128 padded). f32 h cast to bf16 in-register (no wrapper convert)."""
    x = h_ref[...].astype(w_ref.dtype)
    out = jnp.dot(x, w_ref[...], preferred_element_type=jnp.float32) + b_ref[...]
    o_ref[...] = out.astype(o_ref.dtype)


# ----------------------------------------------------------------------------
# Wrappers (pallas_call plumbing)
# ----------------------------------------------------------------------------
def fc_coord_forward(z, params, *, max_tile=512):
    """z: [G, H] unique-group latents -> [G, 3] pseudo cartesian coords (f32)."""
    w1, b1, w2, b2, w3, b3, w4p, b4p = params
    g, h_dim = z.shape
    out_pad = w4p.shape[1]                       # 128 (lane-dense store path)

    # Typical G is small -> exactly one grid step; balanced tiles for large G.
    steps = max(pl.cdiv(g, max_tile), 1)
    tm = _round_up(pl.cdiv(g, steps), 8)
    if tm >= g:
        tm = g                                   # single full-array block
    grid = (pl.cdiv(g, tm),)

    def row_spec(shape):
        return pl.BlockSpec(shape, lambda i: (i, 0))

    def full_spec(shape):
        return pl.BlockSpec(shape, lambda i: (0, 0))

    out = pl.pallas_call(
        fc_coord_kernel,
        out_shape=jax.ShapeDtypeStruct((g, out_pad), jnp.float32),
        grid=grid,
        in_specs=[
            row_spec((tm, h_dim)),               # activation tile
            full_spec(w1.shape), full_spec(b1.shape),
            full_spec(w2.shape), full_spec(b2.shape),
            full_spec(w3.shape), full_spec(b3.shape),
            full_spec(w4p.shape), full_spec(b4p.shape),
        ],
        out_specs=row_spec((tm, out_pad)),
        compiler_params=pltpu.CompilerParams(dimension_semantics=("parallel",)),
    )(z, w1, b1, w2, b2, w3, b3, w4p, b4p)
    return out[:, :COORD_DIM]                    # padded columns are exact zeros


def fc_atom_forward(h, w_p, b_p, *, max_tile=1024, min_steps=2,
                    buffer_count=None, out_dim=MAX_ATOMIC_NUM, return_padded=False):
    """h: [N, 512] decoder features (f32) -> [N, 100] atom-type logits (f32).

    w_p / b_p are the prepared (padded-to-128, bf16/f32) parameters from
    prepare_params().  No wrapper-side cast, pad, or row slice on the hot path.
    """
    n, d = h.shape
    out_pad = w_p.shape[1]                       # 128

    # Tile from the grid, not the grid from the tile (<16 wasted rows for any n).
    steps = max(pl.cdiv(n, max_tile), min_steps)
    tm = _round_up(pl.cdiv(n, steps), 16)
    if tm >= n:
        tm = n                                   # single full-array block
    grid = (pl.cdiv(n, tm),)

    h_spec_kwargs = {}
    if buffer_count is not None:
        # v7x: Buffered(3) hides fixed DMA issue latency at 3.2 TB/s (sweep 2-4).
        h_spec_kwargs["pipeline_mode"] = pl.Buffered(buffer_count)

    cost = pl.CostEstimate(
        flops=int(2 * n * d * out_pad),
        transcendentals=0,
        bytes_accessed=int(n * d * h.dtype.itemsize
                           + w_p.size * w_p.dtype.itemsize
                           + b_p.size * b_p.dtype.itemsize
                           + n * out_pad * 4))

    out = pl.pallas_call(
        fc_atom_kernel,
        out_shape=jax.ShapeDtypeStruct((n, out_pad), jnp.float32),
        grid=grid,
        in_specs=[
            pl.BlockSpec((tm, d), lambda i: (i, 0), **h_spec_kwargs),
            pl.BlockSpec(w_p.shape, lambda i: (0, 0)),
            pl.BlockSpec(b_p.shape, lambda i: (0, 0)),
        ],
        out_specs=pl.BlockSpec((tm, out_pad), lambda i: (i, 0)),
        compiler_params=pltpu.CompilerParams(
            dimension_semantics=("parallel",),
            vmem_limit_bytes=32 * 1024 * 1024),  # headroom if max_tile is raised
        cost_estimate=cost,
    )(h, w_p, b_p)

    if return_padded:
        # Pad columns hold NEG_FILL -> directly consumable by softmax/argmax
        # over 128 lanes; avoids the column-slice copy entirely.
        return out
    return out[:, :out_dim]


# ----------------------------------------------------------------------------
# Parameters: raw nn.Linear-style init + one-time kernel-ready preparation
# ----------------------------------------------------------------------------
def init_params(key):
    H = HIDDEN_FEATURES
    ks = jax.random.split(key, 10)

    def lin(kw, kb, din, dout):
        w = jax.random.normal(kw, (din, dout), jnp.float32) * (1.0 / np.sqrt(din))
        b = jax.random.normal(kb, (1, dout), jnp.float32) * 0.01
        return w, b

    w1, b1 = lin(ks[0], ks[1], H, H)
    w2, b2 = lin(ks[2], ks[3], H, H)
    w3, b3 = lin(ks[4], ks[5], H, H)
    w4, b4 = lin(ks[6], ks[7], H, COORD_DIM)
    wa, ba = lin(ks[8], ks[9], DECODER_H_DIM, MAX_ATOMIC_NUM)
    return (w1, b1, w2, b2, w3, b3, w4, b4), (wa, ba)


def prepare_params(fc_coord_params, fc_atom_params):
    """Hoisted one-time prep (review: never re-pad/cast weights on the dispatch path)."""
    w1, b1, w2, b2, w3, b3, w4, b4 = fc_coord_params
    # Lane-dense fc_coord store: pad last Linear to 128 output columns (zeros).
    w4p = jnp.pad(w4, ((0, 0), (0, LANE - w4.shape[1])))
    b4p = jnp.pad(b4, ((0, 0), (0, LANE - b4.shape[1])))
    fc_coord_prepped = (w1, b1, w2, b2, w3, b3, w4p, b4p)

    wa, ba = fc_atom_params
    out_pad = _round_up(wa.shape[1], LANE)       # 100 -> 128
    wa_p = jnp.pad(wa, ((0, 0), (0, out_pad - wa.shape[1]))).astype(jnp.bfloat16)
    ba_p = jnp.pad(ba, ((0, 0), (0, out_pad - ba.shape[1])),
                   constant_values=NEG_FILL).astype(jnp.float32)
    return fc_coord_prepped, (wa_p, ba_p)


# ----------------------------------------------------------------------------
# Host-side glue (hoisted out of the per-step forward per review)
# ----------------------------------------------------------------------------
def compute_rep_type(target_atom_types_per_crystal):
    """unique_consecutive counts per crystal, concatenated (data-dependent)."""
    rep = []
    for types in target_atom_types_per_crystal:
        types = np.asarray(types)
        change = np.flatnonzero(np.diff(types)) + 1
        bounds = np.concatenate([[0], change, [len(types)]])
        rep.extend((bounds[1:] - bounds[:-1]).tolist())
    rep_type = np.asarray(rep, dtype=np.int32)
    total_atoms = int(rep_type.sum())
    assert total_atoms == sum(len(t) for t in target_atom_types_per_crystal)
    return rep_type, total_atoms


# ----------------------------------------------------------------------------
# Forward (mirrors latticeDEC.forward)
# ----------------------------------------------------------------------------
def lattice_dec_forward(z, rep_type, total_atoms, fc_coord_params, fc_atom_params):
    # ---- predict_coord ----
    # fc_coord is a row-wise MLP, so fc_coord(repeat_interleave(z)) equals
    # repeat_interleave(fc_coord(z)); compute on the G unique rows and repeat
    # the tiny [G,3] result -> no [N,H] repeated-latent HBM round-trip.
    coord_per_group = fc_coord_forward(z, fc_coord_params)            # [G, 3]
    pseudo_cart_coord = jnp.repeat(coord_per_group, jnp.asarray(rep_type),
                                   axis=0, total_repeat_length=total_atoms)

    # ---- decoder ----
    # TODO(synk): external Decoder() has no reference implementation; stand in
    # with deterministic synthetic features and the pseudo coords.
    h = jax.random.normal(jax.random.PRNGKey(42),
                          (total_atoms, DECODER_H_DIM), jnp.float32)
    pred_cart_coord = pseudo_cart_coord

    # ---- fc_atom: Linear(512, MAX_ATOMIC_NUM) (Pallas; in-kernel bf16 cast) ----
    wa_p, ba_p = fc_atom_params
    pred_atom_types = fc_atom_forward(h, wa_p, ba_p)                  # [N, 100]
    return pred_cart_coord, pred_atom_types, h


# ----------------------------------------------------------------------------
# Pure-JAX references (correctness checks)
# ----------------------------------------------------------------------------
def ref_fc_coord(x, params):
    w1, b1, w2, b2, w3, b3, w4, b4 = params
    h = jnp.maximum(x @ w1 + b1, 0.0)
    h = jnp.maximum(h @ w2 + b2, 0.0)
    h = jnp.maximum(h @ w3 + b3, 0.0)
    return h @ w4 + b4


if __name__ == "__main__":
    key = jax.random.PRNGKey(0)
    k_params, k_z = jax.random.split(key)

    raw_coord_params, raw_atom_params = init_params(k_params)
    fc_coord_params, fc_atom_params = prepare_params(raw_coord_params, raw_atom_params)

    # Synthetic batch of 2 crystals (8 atoms each -> 16 atoms total).
    # unique_consecutive counts: crystal0 -> [3, 5], crystal1 -> [4, 4]
    target_atom_types_per_crystal = [
        np.array([6, 6, 6, 8, 8, 8, 8, 8]),
        np.array([1, 1, 1, 1, 7, 7, 7, 7]),
    ]
    rep_type, total_atoms = compute_rep_type(target_atom_types_per_crystal)
    num_groups = len(rep_type)                    # 4 consecutive groups
    z = jax.random.normal(k_z, (num_groups, HIDDEN_FEATURES), jnp.float32)

    pred_cart_coord, pred_atom_types, h = lattice_dec_forward(
        z, rep_type, total_atoms, fc_coord_params, fc_atom_params)
    jax.block_until_ready((pred_cart_coord, pred_atom_types))

    # --- fc_coord vs literal spec order (repeat -> MLP) in pure f32 JAX ---
    z_per_atom = jnp.repeat(z, jnp.asarray(rep_type), axis=0,
                            total_repeat_length=total_atoms)
    ref_coord = ref_fc_coord(z_per_atom, raw_coord_params)
    np.testing.assert_allclose(np.asarray(pred_cart_coord), np.asarray(ref_coord),
                               rtol=1e-4, atol=1e-5)

    # --- fc_atom vs a reference using the same bf16 operands (tight) ---
    wa, ba = raw_atom_params
    ref_atoms_bf16 = jnp.dot(h.astype(jnp.bfloat16), wa.astype(jnp.bfloat16),
                             preferred_element_type=jnp.float32) + ba
    np.testing.assert_allclose(np.asarray(pred_atom_types), np.asarray(ref_atoms_bf16),
                               rtol=1e-3, atol=1e-3)

    # --- quantify bf16-vs-f32 deviation explicitly (loose sanity check) ---
    ref_atoms_f32 = h @ wa + ba
    np.testing.assert_allclose(np.asarray(pred_atom_types), np.asarray(ref_atoms_f32),
                               rtol=1e-1, atol=1e-1)

    assert pred_cart_coord.shape == (total_atoms, COORD_DIM)
    assert pred_atom_types.shape == (total_atoms, MAX_ATOMIC_NUM)

    print("KERNEL_OK")
</pallas_src>

<mosaic_0001>
module attributes {stable_mosaic.version = 11 : i64} {
  func.func @fc_coord_kernel(%arg0: i32, %arg1: memref<4x32xf32, #tpu.memory_space<vmem>>, %arg2: memref<32x32xf32, #tpu.memory_space<vmem>>, %arg3: memref<1x32xf32, #tpu.memory_space<vmem>>, %arg4: memref<32x32xf32, #tpu.memory_space<vmem>>, %arg5: memref<1x32xf32, #tpu.memory_space<vmem>>, %arg6: memref<32x32xf32, #tpu.memory_space<vmem>>, %arg7: memref<1x32xf32, #tpu.memory_space<vmem>>, %arg8: memref<32x128xf32, #tpu.memory_space<vmem>>, %arg9: memref<1x128xf32, #tpu.memory_space<vmem>>, %arg10: memref<4x128xf32, #tpu.memory_space<vmem>>) attributes {dimension_semantics = [#tpu.dimension_semantics<parallel>], iteration_bounds = array<i64: 1>, scalar_prefetch = 0 : i64, scratch_operands = 0 : i64, tpu.core_type = #tpu.core_type<tc>, window_params = [{transform_indices = @transform_0, window_bounds = array<i64: 4, 32>}, {pipeline_mode = #tpu.pipeline_mode<synchronous>, transform_indices = @transform_1, window_bounds = array<i64: 32, 32>}, {pipeline_mode = #tpu.pipeline_mode<synchronous>, transform_indices = @transform_2, window_bounds = array<i64: 1, 32>}, {pipeline_mode = #tpu.pipeline_mode<synchronous>, transform_indices = @transform_3, window_bounds = array<i64: 32, 32>}, {pipeline_mode = #tpu.pipeline_mode<synchronous>, transform_indices = @transform_4, window_bounds = array<i64: 1, 32>}, {pipeline_mode = #tpu.pipeline_mode<synchronous>, transform_indices = @transform_5, window_bounds = array<i64: 32, 32>}, {pipeline_mode = #tpu.pipeline_mode<synchronous>, transform_indices = @transform_6, window_bounds = array<i64: 1, 32>}, {pipeline_mode = #tpu.pipeline_mode<synchronous>, transform_indices = @transform_7, window_bounds = array<i64: 32, 128>}, {pipeline_mode = #tpu.pipeline_mode<synchronous>, transform_indices = @transform_8, window_bounds = array<i64: 1, 128>}, {transform_indices = @transform_9, window_bounds = array<i64: 4, 128>}]} {
    %c0 = arith.constant 0 : index
    %c0_0 = arith.constant 0 : index
    %0 = vector.load %arg1[%c0, %c0_0] : memref<4x32xf32, #tpu.memory_space<vmem>>, vector<4x32xf32>
    %c0_1 = arith.constant 0 : index
    %c0_2 = arith.constant 0 : index
    %1 = vector.load %arg2[%c0_1, %c0_2] : memref<32x32xf32, #tpu.memory_space<vmem>>, vector<32x32xf32>
    %cst = arith.constant dense<0.000000e+00> : vector<4x32xf32>
    %2 = tpu.matmul %0, %1, %cst {dimension_numbers = #tpu.dot_dimension_numbers<[1], [0], [0], [1], [0, 0, 1, 1], [], []>} : vector<4x32xf32>, vector<32x32xf32>, vector<4x32xf32> -> vector<4x32xf32>
    %c0_3 = arith.constant 0 : index
    %c0_4 = arith.constant 0 : index
    %3 = vector.load %arg3[%c0_3, %c0_4] : memref<1x32xf32, #tpu.memory_space<vmem>>, vector<1x32xf32>
    %4 = vector.broadcast %3 : vector<1x32xf32> to vector<4x32xf32>
    %5 = arith.addf %2, %4 : vector<4x32xf32>
    %cst_5 = arith.constant 0.000000e+00 : f32
    %6 = vector.broadcast %cst_5 : f32 to vector<4x32xf32>
    %7 = arith.maximumf %5, %6 : vector<4x32xf32>
    %c0_6 = arith.constant 0 : index
    %c0_7 = arith.constant 0 : index
    %8 = vector.load %arg4[%c0_6, %c0_7] : memref<32x32xf32, #tpu.memory_space<vmem>>, vector<32x32xf32>
    %cst_8 = arith.constant dense<0.000000e+00> : vector<4x32xf32>
    %9 = tpu.matmul %7, %8, %cst_8 {dimension_numbers = #tpu.dot_dimension_numbers<[1], [0], [0], [1], [0, 0, 1, 1], [], []>} : vector<4x32xf32>, vector<32x32xf32>, vector<4x32xf32> -> vector<4x32xf32>
    %c0_9 = arith.constant 0 : index
    %c0_10 = arith.constant 0 : index
    %10 = vector.load %arg5[%c0_9, %c0_10] : memref<1x32xf32, #tpu.memory_space<vmem>>, vector<1x32xf32>
    %11 = vector.broadcast %10 : vector<1x32xf32> to vector<4x32xf32>
    %12 = arith.addf %9, %11 : vector<4x32xf32>
    %cst_11 = arith.constant 0.000000e+00 : f32
    %13 = vector.broadcast %cst_11 : f32 to vector<4x32xf32>
    %14 = arith.maximumf %12, %13 : vector<4x32xf32>
    %c0_12 = arith.constant 0 : index
    %c0_13 = arith.constant 0 : index
    %15 = vector.load %arg6[%c0_12, %c0_13] : memref<32x32xf32, #tpu.memory_space<vmem>>, vector<32x32xf32>
    %cst_14 = arith.constant dense<0.000000e+00> : vector<4x32xf32>
    %16 = tpu.matmul %14, %15, %cst_14 {dimension_numbers = #tpu.dot_dimension_numbers<[1], [0], [0], [1], [0, 0, 1, 1], [], []>} : vector<4x32xf32>, vector<32x32xf32>, vector<4x32xf32> -> vector<4x32xf32>
    %c0_15 = arith.constant 0 : index
    %c0_16 = arith.constant 0 : index
    %17 = vector.load %arg7[%c0_15, %c0_16] : memref<1x32xf32, #tpu.memory_space<vmem>>, vector<1x32xf32>
    %18 = vector.broadcast %17 : vector<1x32xf32> to vector<4x32xf32>
    %19 = arith.addf %16, %18 : vector<4x32xf32>
    %cst_17 = arith.constant 0.000000e+00 : f32
    %20 = vector.broadcast %cst_17 : f32 to vector<4x32xf32>
    %21 = arith.maximumf %19, %20 : vector<4x32xf32>
    %c0_18 = arith.constant 0 : index
    %c0_19 = arith.constant 0 : index
    %22 = vector.load %arg8[%c0_18, %c0_19] : memref<32x128xf32, #tpu.memory_space<vmem>>, vector<32x128xf32>
    %cst_20 = arith.constant dense<0.000000e+00> : vector<4x128xf32>
    %23 = tpu.matmul %21, %22, %cst_20 {dimension_numbers = #tpu.dot_dimension_numbers<[1], [0], [0], [1], [0, 0, 1, 1], [], []>} : vector<4x32xf32>, vector<32x128xf32>, vector<4x128xf32> -> vector<4x128xf32>
    %c0_21 = arith.constant 0 : index
    %c0_22 = arith.constant 0 : index
    %24 = vector.load %arg9[%c0_21, %c0_22] : memref<1x128xf32, #tpu.memory_space<vmem>>, vector<1x128xf32>
    %25 = vector.broadcast %24 : vector<1x128xf32> to vector<4x128xf32>
    %26 = arith.addf %23, %25 : vector<4x128xf32>
    %c0_23 = arith.constant 0 : index
    %c0_24 = arith.constant 0 : index
    %27 = vector.load %arg10[%c0_23, %c0_24] : memref<4x128xf32, #tpu.memory_space<vmem>>, vector<4x128xf32>
    tpu.vector_store %arg10[%c0_23, %c0_24], %26 {strides = array<i32>} : memref<4x128xf32, #tpu.memory_space<vmem>>, vector<4x128xf32>,
    return
  }
  func.func @transform_0(%arg0: i32) -> (i32, i32) {
    %c0_i32 = arith.constant 0 : i32
    %c0_i32_0 = arith.constant 0 : i32
    return %arg0, %c0_i32 : i32, i32
  }
  func.func @transform_1(%arg0: i32) -> (i32, i32) {
    %c0_i32 = arith.constant 0 : i32
    %c0_i32_0 = arith.constant 0 : i32
    %c0_i32_1 = arith.constant 0 : i32
    return %c0_i32, %c0_i32_0 : i32, i32
  }
  func.func @transform_2(%arg0: i32) -> (i32, i32) {
    %c0_i32 = arith.constant 0 : i32
    %c0_i32_0 = arith.constant 0 : i32
    %c0_i32_1 = arith.constant 0 : i32
    return %c0_i32, %c0_i32_0 : i32, i32
  }
  func.func @transform_3(%arg0: i32) -> (i32, i32) {
    %c0_i32 = arith.constant 0 : i32
    %c0_i32_0 = arith.constant 0 : i32
    %c0_i32_1 = arith.constant 0 : i32
    return %c0_i32, %c0_i32_0 : i32, i32
  }
  func.func @transform_4(%arg0: i32) -> (i32, i32) {
    %c0_i32 = arith.constant 0 : i32
    %c0_i32_0 = arith.constant 0 : i32
    %c0_i32_1 = arith.constant 0 : i32
    return %c0_i32, %c0_i32_0 : i32, i32
  }
  func.func @transform_5(%arg0: i32) -> (i32, i32) {
    %c0_i32 = arith.constant 0 : i32
    %c0_i32_0 = arith.constant 0 : i32
    %c0_i32_1 = arith.constant 0 : i32
    return %c0_i32, %c0_i32_0 : i32, i32
  }
  func.func @transform_6(%arg0: i32) -> (i32, i32) {
    %c0_i32 = arith.constant 0 : i32
    %c0_i32_0 = arith.constant 0 : i32
    %c0_i32_1 = arith.constant 0 : i32
    return %c0_i32, %c0_i32_0 : i32, i32
  }
  func.func @transform_7(%arg0: i32) -> (i32, i32) {
    %c0_i32 = arith.constant 0 : i32
    %c0_i32_0 = arith.constant 0 : i32
    %c0_i32_1 = arith.constant 0 : i32
    return %c0_i32, %c0_i32_0 : i32, i32
  }
  func.func @transform_8(%arg0: i32) -> (i32, i32) {
    %c0_i32 = arith.constant 0 : i32
    %c0_i32_0 = arith.constant 0 : i32
    %c0_i32_1 = arith.constant 0 : i32
    return %c0_i32, %c0_i32_0 : i32, i32
  }
  func.func @transform_9(%arg0: i32) -> (i32, i32) {
    %c0_i32 = arith.constant 0 : i32
    %c0_i32_0 = arith.constant 0 : i32
    return %arg0, %c0_i32 : i32, i32
  }
}

</mosaic_0001>

<bundles_post_ra>
// kernel: tpu_custom_call.1
= control target key start
LH: loop header
LB: loop body
LE: loop exit
PB: predicated region body
PF: predicated region fallthrough
CT: control target
= control target key end

     0   :  { %14 = vsyncpa [#allocation3], 0  ;;  %s870_s0 = inlined_call_operand.hbm [shape: f32[4,32], index: 0, kind: input, shape index: {}]   ;;  %s871_s1 = inlined_call_operand.hbm [shape: f32[32,32], index: 1, kind: input, shape index: {}]   ;;  %s872_s2 = inlined_call_operand.vmem [shape: f32[1,32], index: 2, kind: input, shape index: {}]   ;;  %s873_s3 = inlined_call_operand.hbm [shape: f32[32,32], index: 3, kind: input, shape index: {}]   ;;  %s874_s4 = inlined_call_operand.vmem [shape: f32[1,32], index: 4, kind: input, shape index: {}]   ;;  %s875_s5 = inlined_call_operand.hbm [shape: f32[32,32], index: 5, kind: input, shape index: {}]   ;;  %s876_s6 = inlined_call_operand.vmem [shape: f32[1,32], index: 6, kind: input, shape index: {}]   ;;  %s877_s7 = inlined_call_operand.hbm [shape: f32[32,128], index: 7, kind: input, shape index: {}]   ;;  %s878_s8 = inlined_call_operand.vmem [shape: f32[1,128], index: 8, kind: input, shape index: {}]   ;;  %s879_s9 = inlined_call_operand.hbm [shape: f32[4,128], index: 9, kind: output, shape index: {}]  }
   0x1   :  { %15 = vsyncpa [#allocation6], 0 }
   0x2   :  { %16 = vsyncpa [#allocation9], 0 }
   0x3   :  { %17 = vsyncpa [#allocation4], 0  ;;  %s705_s30 = smov [#allocation5]   ;;  %s565_s13 = scalar_lea.hbm %s871_s1, 512 }
   0x4   :  { %s33_s10 = sshll.u32 %s705_s30, 4  ;;  %p566_p0 = scmp.ne.s32.totalorder %s871_s1, %s565_s13  ;;  %s34_s10 = int_to_ptr.vmem [resolvable:$true] %s33_s10 }
   0x5   :  { %p569_p1 = scmp.lt.u32.totalorder %s565_s13, %s871_s1 }
   0x7   :  { %p571_p2 = pnand %p569_p1, %p566_p0 }
   0x9   :  { %574 = shalt.err (!%p571_p2)
}
   0xa   :  { %s575_s18 = scalar_lea.vmem %s34_s10, 512  ;;  %p580_p4 = scmp.lt.s32.totalorder %s34_s10, %s34_s10 }
   0xb   :  { %p576_p3 = scmp.ne.s32.totalorder %s34_s10, %s575_s18  ;;  %p581_p5 = scmp.lt.s32.totalorder %s575_s18, %s575_s18 }
   0xd   :  { %p582_p6 = por %p581_p5, %p580_p4 }
   0xf   :  { %p583_p7 = pnand %p582_p6, %p576_p3 }
  0x11   :  { %586 = shalt.err (!%p583_p7)
}
  0x12   :  { %s706_s19 = smov 128   ;;  %s707_s20 = smov 8  }
  0x13   :  { %39 = dma.hbm_to_vmem [thread:$0]  %s871_s1, 512, %s34_s10, [#allocation6], %s706_s19, %s706_s19, %s707_s20  }
  0x14   :  { %s708_s23 = smov [#allocation8]   ;;  %s709_s25 = smov [#allocation2]  }
  0x15   :  { %s61_s24 = sshll.u32 %s708_s23, 4  ;;  %s24_s26 = sshll.u32 %s709_s25, 4  ;;  %s62_s24 = int_to_ptr.vmem [resolvable:$true] %s61_s24  ;;  %s25_s26 = int_to_ptr.vmem [resolvable:$true] %s24_s26 }
  0x16   :  { %s587_s29 = scalar_lea.hbm %s875_s5, 512 }
  0x17   :  { %p588_p8 = scmp.ne.s32.totalorder %s875_s5, %s587_s29  ;;  %p591_p9 = scmp.lt.u32.totalorder %s587_s29, %s875_s5 }
  0x19   :  { %p593_p10 = pnand %p591_p9, %p588_p8 }
  0x1b   :  { %596 = shalt.err (!%p593_p10)
}
  0x1c   :  { %s597_s1 = scalar_lea.vmem %s62_s24, 512  ;;  %p602_p12 = scmp.lt.s32.totalorder %s62_s24, %s62_s24 }
  0x1d   :  { %p598_p11 = scmp.ne.s32.totalorder %s62_s24, %s597_s1  ;;  %p603_p13 = scmp.lt.s32.totalorder %s597_s1, %s597_s1 }
  0x1f   :  { %p604_p0 = por %p603_p13, %p602_p12 }
  0x21   :  { %p605_p1 = pnand %p604_p0, %p598_p11 }
  0x23   :  { %608 = shalt.err (!%p605_p1)
}
  0x24   :  { %67 = dma.hbm_to_vmem [thread:$0]  %s875_s5, 512, %s62_s24, [#allocation9], %s706_s19, %s706_s19, %s707_s20  }
  0x25   :  { %s609_s17 = scalar_lea.hbm %s870_s0, 64 }
  0x26   :  { %p610_p2 = scmp.ne.s32.totalorder %s870_s0, %s609_s17  ;;  %p613_p3 = scmp.lt.u32.totalorder %s609_s17, %s870_s0 }
  0x28   :  { %p615_p4 = pnand %p613_p3, %p610_p2 }
  0x2a   :  { %618 = shalt.err (!%p615_p4)
}
  0x2b   :  { %s619_s25 = scalar_lea.vmem %s25_s26, 64  ;;  %p624_p6 = scmp.lt.s32.totalorder %s25_s26, %s25_s26 }
  0x2c   :  { %p620_p5 = scmp.ne.s32.totalorder %s25_s26, %s619_s25  ;;  %p625_p7 = scmp.lt.s32.totalorder %s619_s25, %s619_s25 }
  0x2e   :  { %p626_p8 = por %p625_p7, %p624_p6 }
  0x30   :  { %p627_p9 = pnand %p626_p8, %p620_p5 }
  0x32   :  { %630 = shalt.err (!%p627_p9)
}
  0x33   :  { %27 = dma.hbm_to_vmem [thread:$0]  %s870_s0, 64, %s25_s26, [#allocation3]  }
  0x34   :  { %s710_s27 = smov [#allocation7]   ;;  %s711_s29 = smov [#allocation10]  }
  0x35   :  { %s47_s28 = sshll.u32 %s710_s27, 4  ;;  %s75_s30 = sshll.u32 %s711_s29, 4  ;;  %s48_s28 = int_to_ptr.vmem [resolvable:$true] %s47_s28  ;;  %s76_s30 = int_to_ptr.vmem [resolvable:$true] %s75_s30 }
  0x36   :  { %s631_s13 = scalar_lea.hbm %s873_s3, 512 }
  0x37   :  { %p632_p10 = scmp.ne.s32.totalorder %s873_s3, %s631_s13  ;;  %p635_p11 = scmp.lt.u32.totalorder %s631_s13, %s873_s3 }
  0x39   :  { %p637_p12 = pnand %p635_p11, %p632_p10 }
  0x3b   :  { %640 = shalt.err (!%p637_p12)
}
  0x3c   :  { %s641_s0 = scalar_lea.vmem %s48_s28, 512  ;;  %p646_p0 = scmp.lt.s32.totalorder %s48_s28, %s48_s28 }
  0x3d   :  { %p642_p13 = scmp.ne.s32.totalorder %s48_s28, %s641_s0  ;;  %p647_p1 = scmp.lt.s32.totalorder %s641_s0, %s641_s0 }
  0x3f   :  { %p648_p2 = por %p647_p1, %p646_p0 }
  0x41   :  { %p649_p3 = pnand %p648_p2, %p642_p13 }
  0x43   :  { %652 = shalt.err (!%p649_p3)
}
  0x44   :  { %53 = dma.hbm_to_vmem [thread:$0]  %s873_s3, 512, %s48_s28, [#allocation6], %s706_s19, %s706_s19, %s707_s20  }
  0x45   :  { %s653_s21 = scalar_lea.hbm %s877_s7, 512 }
  0x46   :  { %p654_p4 = scmp.ne.s32.totalorder %s877_s7, %s653_s21  ;;  %p657_p5 = scmp.lt.u32.totalorder %s653_s21, %s877_s7 }
  0x48   :  { %p659_p6 = pnand %p657_p5, %p654_p4 }
  0x4a   :  { %662 = shalt.err (!%p659_p6)
}
  0x4b   :  { %s663_s24 = scalar_lea.vmem %s76_s30, 512  ;;  %p668_p8 = scmp.lt.s32.totalorder %s76_s30, %s76_s30 }
  0x4c   :  { %p664_p7 = scmp.ne.s32.totalorder %s76_s30, %s663_s24  ;;  %p669_p9 = scmp.lt.s32.totalorder %s663_s24, %s663_s24 }
  0x4e   :  { %p670_p10 = por %p669_p9, %p668_p8 }
  0x50   :  { %p671_p11 = pnand %p670_p10, %p664_p7 }
  0x52   :  { %674 = shalt.err (!%p671_p11)
}
  0x53   :  { %81 = dma.hbm_to_vmem [thread:$0]  %s877_s7, 512, %s76_s30, [#allocation9], %s706_s19, %s706_s19, %s707_s20  }
  0x54   :  { %697 = dma.done.wait [#allocation3], 64  }
  0x55   :  { %698 = vsyncadd [#allocation3], 4294967232 }
  0x56   :  { %699 = dma.done.wait [#allocation6], 1024  }
  0x57   :  { %700 = vsyncadd [#allocation6], 4294966272 }
  0x58   :  { %701 = dma.done.wait [#allocation9], 1024  }
  0x59   :  { %702 = vsyncadd [#allocation9], 4294966272  ;;  %v712_v0 = vmov 0.0|0.0   ;;  %vm713_vm0 = vmmov 0   ;;  %v714_v1 = vmov 0.0   ;;  %v100_v2 = vld [vmem:[#allocation5] sm:$0xff] }
  0x5a   :  { %530 = vmatprep.subr.bf16.mxu0 %v712_v0  ;;  %494 = vmatprep.mubr.msk.f32.mxu0 %vm713_vm0, %v714_v1  ;;  %v101_v3 = vld [vmem:[#allocation5 + $0x8] sm:$0xff]  ;;  %v102_v4 = vld [vmem:[#allocation5 + $0x10] sm:$0xff]  ;;  %v103_v6 = vld [vmem:[#allocation5 + $0x18] sm:$0xff]  ;;  %vm111_vm1 = vcmask 261120   ;;  %s715_s11 = smov [#allocation11]  }
  0x5b   :  { %536 = vmatprep.subr.bf16.mxu1 %v712_v0  ;;  %505 = vmatprep.mubr.msk.f32.mxu1 %vm713_vm0, %v714_v1  ;;  %v531_v5 = vpack.c.bf16 %v101_v3, %v100_v2  ;;  %v186_v7 = vld [vmem:[#allocation7] sm:$0xff]  ;;  %v187_v8 = vld [vmem:[#allocation7 + $0x8] sm:$0xff]  ;;  %v534_v9 = vpack.c.bf16 %v103_v6, %v102_v4  ;;  %v99_v11 = vld [vmem:[#allocation2] sm:$0xf]  ;;  %s447_s12 = sshll.u32 %s715_s11, 4  ;;  %s448_s12 = int_to_ptr.vmem [resolvable:$true] %s447_s12 }
  0x5c   :  { %v537_v10 = vpack.c.bf16 %v187_v8, %v186_v7  ;;  %v188_v12 = vld [vmem:[#allocation7 + $0x10] sm:$0xff]  ;;  %v189_v13 = vld [vmem:[#allocation7 + $0x18] sm:$0xff]  ;;  %v271_v15 = vld [vmem:[#allocation8] sm:$0xff]  ;;  %s675_s13 = scalar_lea.vmem %s448_s12, 64  ;;  %p680_p13 = scmp.lt.s32.totalorder %s448_s12, %s448_s12 }
  0x5d   :  { %532 = vmatpush3.bf16.msra.mxu0 %v531_v5  ;;  %v540_v14 = vpack.c.bf16 %v189_v13, %v188_v12  ;;  %v272_v16 = vld [vmem:[#allocation8 + $0x8] sm:$0xff]  ;;  %v458_v18 = vld [vmem:[%s872_s2] ss:$0 sm:$0xff]  ;;  %v273_v23 = vld [vmem:[#allocation8 + $0x10] sm:$0xff]  ;;  %p676_p12 = scmp.ne.s32.totalorder %s448_s12, %s675_s13  ;;  %p681_p0 = scmp.lt.s32.totalorder %s675_s13, %s675_s13 }
  0x5e   :  { %533 = vmatprep.subr.bf16.mxu0 %v712_v0  ;;  %538 = vmatpush3.bf16.msra.mxu1 %v537_v10  ;;  %v543_v17 = vpack.c.bf16 %v272_v16, %v271_v15  ;;  %v274_v24 = vld [vmem:[#allocation8 + $0x18] sm:$0xff]  ;;  %v356_v26 = vld [vmem:[#allocation10] sm:$0xff]  ;;  %v357_v27 = vld [vmem:[#allocation10 + $0x8] sm:$0xff] }
  0x5f   :  { %539 = vmatprep.subr.bf16.mxu1 %v712_v0  ;;  %v546_v25 = vpack.c.bf16 %v274_v24, %v273_v23  ;;  %v549_v28 = vpack.c.bf16 %v357_v27, %v356_v26  ;;  %v460_v29 = vld [vmem:[%s874_s4] ss:$0 sm:$0xff]  ;;  %v358_v34 = vld [vmem:[#allocation10 + $0x10] sm:$0xff]  ;;  %p682_p1 = por %p681_p0, %p680_p13 }
  0x60   :  { %v359_v35 = vld [vmem:[#allocation10 + $0x18] sm:$0xff] }
  0x61   :  { %535 = vmatpush3.bf16.msra.mxu0 %v534_v9  ;;  %v552_v36 = vpack.c.bf16 %v359_v35, %v358_v34  ;;  %v462_v37 = vld [vmem:[%s876_s6] ss:$0 sm:$0xff]  ;;  %p683_p2 = pnand %p682_p1, %p676_p12 }
  0x62   :  { %542 = vmatprep.subr.bf16.mxu0 %v712_v0  ;;  %541 = vmatpush3.bf16.msra.mxu1 %v540_v14  ;;  %v464_v42 = vld [vmem:[%s878_s8] ss:$0 sm:$0xff] }
  0x63   :  { %548 = vmatprep.subr.bf16.mxu1 %v712_v0 }
  0x64   :  { %495 = vmatmul.mubr.msk.f32.vlgmr.msra.gmra.mrb[0].mxu0 %vm111_vm1, %v99_v11 }
  0x65   :  { %516 = vmatprep.mubr.msk.f32.mxu0 %vm713_vm0, %v714_v1  ;;  %544 = vmatpush3.bf16.msra.mxu0 %v543_v17 }
  0x66   :  { %545 = vmatprep.subr.bf16.mxu0 %v712_v0 }
  0x69   :  { %547 = vmatpush3.bf16.msra.mxu0 %v546_v25 }
 0x137   :  { %v181_v19 = vpop.f32.mrb[0].mxu0 }
 0x138   :  { %v182_v20 = vadd.f32 %v458_v18, %v181_v19  ;;  %v496_v21 = vpop.f32.mrb[1].mxu0 }
 0x13a   :  { %v185_v22 = vmax.f32 %v182_v20, 0.0 }
 0x13c   :  { %506 = vmatmul.mubr.msk.f32.vlgmr.msra.gmra.mrb[0].mxu1 %vm111_vm1, %v185_v22 }
 0x13d   :  { %527 = vmatprep.mubr.msk.f32.mxu1 %vm713_vm0, %v714_v1  ;;  %550 = vmatpush3.bf16.msra.mxu1 %v549_v28 }
 0x13e   :  { %551 = vmatprep.subr.bf16.mxu1 %v712_v0 }
 0x141   :  { %553 = vmatpush3.bf16.msra.mxu1 %v552_v36 }
 0x20f   :  { %v266_v30 = vpop.f32.mrb[0].mxu1 }
 0x210   :  { %v267_v31 = vadd.f32 %v460_v29, %v266_v30  ;;  %v507_v32 = vpop.f32.mrb[1].mxu1 }
 0x212   :  { %v270_v33 = vmax.f32 %v267_v31, 0.0 }
 0x214   :  { %517 = vmatmul.mubr.msk.f32.vlgmr.msra.gmra.mrb[2].mxu0 %vm111_vm1, %v270_v33 }
 0x2e7   :  { %v351_v38 = vpop.f32.mrb[2].mxu0 }
 0x2e8   :  { %v352_v39 = vadd.f32 %v462_v37, %v351_v38  ;;  %v518_v40 = vpop.f32.mrb[3].mxu0 }
 0x2ea   :  { %v355_v41 = vmax.f32 %v352_v39, 0.0 }
 0x2ec   :  { %528 = vmatmul.mubr.msk.f32.vlgmr.msra.gmra.mrb[2].mxu1 %vm111_vm1, %v355_v41 }
 0x3bf   :  { %v436_v43 = vpop.f32.mrb[2].mxu1 }
 0x3c0   :  { %v437_v44 = vadd.f32 %v464_v42, %v436_v43  ;;  %v529_v45 = vpop.f32.mrb[3].mxu1 }
 0x3c2   :  { %440 = vst [vmem:[#allocation11] sm:$0xf] %v437_v44 }
 0x3c3   :  { %686 = shalt.err (!%p683_p2)
}
 0x3c4   :  { %s687_s10 = scalar_lea.hbm %s879_s9, 64 }
 0x3c5   :  { %p688_p3 = scmp.ne.s32.totalorder %s879_s9, %s687_s10  ;;  %p691_p4 = scmp.lt.u32.totalorder %s687_s10, %s879_s9 }
 0x3c7   :  { %p693_p5 = pnand %p691_p4, %p688_p3 }
 0x3c9   :  { %696 = shalt.err (!%p693_p5)
}
 0x3ca   :  { %450 = dma.vmem_to_hbm [thread:$0]  %s448_s12, 64, %s879_s9, [#allocation4]  }
 0x3cb   :  { %703 = dma.done.wait [#allocation4], 64  }
 0x3cc   :  { %704 = vsyncadd [#allocation4], 4294967232 }
 0x3cd   :  { %454 = vsyncpa [#allocation3], 1 }
 0x3ce   :  { %455 = vsyncpa [#allocation6], 1 }
 0x3cf   :  { %456 = vsyncpa [#allocation9], 1 }
 0x3d0   :  { %457 = vsyncpa [#allocation4], 1 }

</bundles_post_ra>
